<compile_context>
chip_gen: v7x
topology: tpu7x:2x2x1
jax: 0.10.0
libtpu: 0.0.40
codegen_flags: <defaults>
</compile_context>

<pallas_src>
import jax
import jax.numpy as jnp
from jax.experimental import pallas as pl
from jax.experimental.pallas import tpu as pltpu

# CIFAR-10 normalization constants (from the PyTorch module's __init__)
_CIF_MEAN = (0.4914, 0.4822, 0.4465)
_CIF_STD = (0.2023, 0.1994, 0.201)

# Target bytes of `x` per block (input only; output doubles it, pipelining x2 again).
_BLOCK_BYTES_TARGET = 2 * 1024 * 1024


def _cifnorm_kernel(x_ref, scale_ref, shift_ref, o_ref):
    # x_ref / o_ref: (TR, H*W) VMEM tiles; scale_ref / shift_ref: (TR, 1)
    # per-row affine params, lane-broadcast by the VPU.
    o_ref[...] = x_ref[...] * scale_ref[...] + shift_ref[...]


def cif_norm(x: jax.Array) -> jax.Array:
    """(x - mean) / stdev with per-channel CIFAR stats. x is NCHW."""
    N, C, H, W = x.shape
    assert C == len(_CIF_MEAN), "CifNorm hard-codes 3-channel statistics"
    rows, cols = N * C, H * W

    # Lane-dense view: last dim is H*W (a multiple of 128 for CIFAR-style sizes).
    x2 = x.reshape(rows, cols)

    # Per-channel affine params in f32, expanded to per-row (row = n*C + c).
    mean = jnp.asarray(_CIF_MEAN, dtype=jnp.float32)
    std = jnp.asarray(_CIF_STD, dtype=jnp.float32)
    scale_c = 1.0 / std          # multiply instead of divide in-kernel
    shift_c = -mean / std
    scale = jnp.tile(scale_c, N).reshape(rows, 1).astype(x.dtype)
    shift = jnp.tile(shift_c, N).reshape(rows, 1).astype(x.dtype)

    # Row-block sizing: biggest block that keeps double-buffered in+out well under
    # the scoped VMEM limit on every generation (v5e 16 MiB default, v7x 64 MiB phys).
    bytes_per_row = cols * x.dtype.itemsize
    if rows * bytes_per_row <= _BLOCK_BYTES_TARGET or rows <= 8:
        tr = rows  # single block == full array dims (always satisfies tiling rule)
    else:
        tr = max(8, (_BLOCK_BYTES_TARGET // bytes_per_row) // 8 * 8)
        tr = min(tr, (rows // 8) * 8)  # keep TR a multiple of 8 (sublane tiling rule)
    grid = (pl.cdiv(rows, tr),)

    out2 = pl.pallas_call(
        _cifnorm_kernel,
        out_shape=jax.ShapeDtypeStruct((rows, cols), x.dtype),
        grid_spec=pltpu.PrefetchScalarGridSpec(
            num_scalar_prefetch=0,
            grid=grid,
            in_specs=[
                pl.BlockSpec((tr, cols), lambda i: (i, 0)),
                pl.BlockSpec((tr, 1), lambda i: (i, 0)),
                pl.BlockSpec((tr, 1), lambda i: (i, 0)),
            ],
            out_specs=pl.BlockSpec((tr, cols), lambda i: (i, 0)),
        ),
        compiler_params=pltpu.CompilerParams(
            # Single "parallel" axis: shards the coarse grid across the two
            # TensorCores on v7x; neutral on v5e/v6e.
            dimension_semantics=("parallel",),
            vmem_limit_bytes=32 * 1024 * 1024,
        ),
    )(x2, scale, shift)

    return out2.reshape(N, C, H, W)


if __name__ == "__main__":
    key = jax.random.PRNGKey(0)
    # CIFAR-style input: batch=2, channels=3 (module hard-codes 3 stats), 16x16 spatial.
    x = jax.random.uniform(key, (2, 3, 16, 16), dtype=jnp.float32)

    out = jax.block_until_ready(cif_norm(x))

    # Reference check in plain JAX (mirrors the PyTorch forward exactly).
    mean = jnp.asarray(_CIF_MEAN, dtype=jnp.float32)[None, :, None, None]
    std = jnp.asarray(_CIF_STD, dtype=jnp.float32)[None, :, None, None]
    ref = (x - mean) / std
    assert out.shape == x.shape and out.dtype == x.dtype
    assert jnp.allclose(out, ref, atol=1e-5, rtol=1e-5)

    print("KERNEL_OK")
</pallas_src>

<mosaic_0001>
module attributes {stable_mosaic.version = 11 : i64} {
  func.func @_cifnorm_kernel(%arg0: i32, %arg1: memref<6x256xf32, #tpu.memory_space<vmem>>, %arg2: memref<6x1xf32, #tpu.memory_space<vmem>>, %arg3: memref<6x1xf32, #tpu.memory_space<vmem>>, %arg4: memref<6x256xf32, #tpu.memory_space<vmem>>) attributes {dimension_semantics = [#tpu.dimension_semantics<parallel>], iteration_bounds = array<i64: 1>, scalar_prefetch = 0 : i64, scratch_operands = 0 : i64, tpu.core_type = #tpu.core_type<tc>, window_params = [{transform_indices = @transform_0, window_bounds = array<i64: 6, 256>}, {transform_indices = @transform_1, window_bounds = array<i64: 6, 1>}, {transform_indices = @transform_2, window_bounds = array<i64: 6, 1>}, {transform_indices = @transform_3, window_bounds = array<i64: 6, 256>}]} {
    %c0 = arith.constant 0 : index
    %c0_0 = arith.constant 0 : index
    %0 = vector.load %arg1[%c0, %c0_0] : memref<6x256xf32, #tpu.memory_space<vmem>>, vector<6x256xf32>
    %c0_1 = arith.constant 0 : index
    %c0_2 = arith.constant 0 : index
    %1 = vector.load %arg2[%c0_1, %c0_2] : memref<6x1xf32, #tpu.memory_space<vmem>>, vector<6x1xf32>
    %2 = vector.broadcast %1 : vector<6x1xf32> to vector<6x256xf32>
    %3 = arith.mulf %0, %2 : vector<6x256xf32>
    %c0_3 = arith.constant 0 : index
    %c0_4 = arith.constant 0 : index
    %4 = vector.load %arg3[%c0_3, %c0_4] : memref<6x1xf32, #tpu.memory_space<vmem>>, vector<6x1xf32>
    %5 = vector.broadcast %4 : vector<6x1xf32> to vector<6x256xf32>
    %6 = arith.addf %3, %5 : vector<6x256xf32>
    %c0_5 = arith.constant 0 : index
    %c0_6 = arith.constant 0 : index
    %7 = vector.load %arg4[%c0_5, %c0_6] : memref<6x256xf32, #tpu.memory_space<vmem>>, vector<6x256xf32>
    tpu.vector_store %arg4[%c0_5, %c0_6], %6 {strides = array<i32>} : memref<6x256xf32, #tpu.memory_space<vmem>>, vector<6x256xf32>,
    return
  }
  func.func @transform_0(%arg0: i32) -> (i32, i32) {
    %c0_i32 = arith.constant 0 : i32
    %c0_i32_0 = arith.constant 0 : i32
    return %arg0, %c0_i32 : i32, i32
  }
  func.func @transform_1(%arg0: i32) -> (i32, i32) {
    %c0_i32 = arith.constant 0 : i32
    %c0_i32_0 = arith.constant 0 : i32
    return %arg0, %c0_i32 : i32, i32
  }
  func.func @transform_2(%arg0: i32) -> (i32, i32) {
    %c0_i32 = arith.constant 0 : i32
    %c0_i32_0 = arith.constant 0 : i32
    return %arg0, %c0_i32 : i32, i32
  }
  func.func @transform_3(%arg0: i32) -> (i32, i32) {
    %c0_i32 = arith.constant 0 : i32
    %c0_i32_0 = arith.constant 0 : i32
    return %arg0, %c0_i32 : i32, i32
  }
}

</mosaic_0001>

<bundles_post_ra>
// kernel: tpu_custom_call.1
= control target key start
LH: loop header
LB: loop body
LE: loop exit
PB: predicated region body
PF: predicated region fallthrough
CT: control target
= control target key end

     0   :  { %v76_v1 = vmov 0   ;;  %s122_s0 = inlined_call_operand.vmem [shape: f32[6,256], index: 0, kind: input, shape index: {}]   ;;  %s123_s1 = inlined_call_operand.vmem [shape: f32[6,1], index: 1, kind: input, shape index: {}]   ;;  %s124_s2 = inlined_call_operand.vmem [shape: f32[6,1], index: 2, kind: input, shape index: {}]   ;;  %s125_s3 = inlined_call_operand.hbm [shape: f32[6,256], index: 3, kind: output, shape index: {}]  }
   0x1   :  { %v17_v0 = vld [vmem:[%s123_s1] sm:$0x3f]  ;;  %51 = vset.pattern.permute.xlu0 %v76_v1 }
   0x2   :  { %8 = vsyncpa [#allocation3], 0  ;;  %20 = vperm.xlu0 %51, %v17_v0   ;;  %v25_v2 = vld [vmem:[%s124_s2] sm:$0x3f]  ;;  %v16_v5 = vld [vmem:[%s122_s0 + $0x8] sm:$0x3f] }
   0x3   :  { %v15_v4 = vld [vmem:[%s122_s0] sm:$0x3f]  ;;  %s77_s20 = smov [#allocation2]  }
   0x4   :  { %s41_s1 = sshll.u32 %s77_s20, 4  ;;  %s42_s1 = int_to_ptr.vmem [resolvable:$true] %s41_s1 }
   0x5   :  { %s52_s2 = scalar_lea.vmem %s42_s1, 256  ;;  %p57_p1 = scmp.lt.s32.totalorder %s42_s1, %s42_s1 }
   0x6   :  { %28 = vperm.xlu0 %51, %v25_v2   ;;  %p53_p0 = scmp.ne.s32.totalorder %s42_s1, %s52_s2  ;;  %p58_p2 = scmp.lt.s32.totalorder %s52_s2, %s52_s2 }
   0x8   :  { %p59_p3 = por %p58_p2, %p57_p1 }
   0xa   :  { %p60_p4 = pnand %p59_p3, %p53_p0 }
  0x81   :  { %v21_v3 = vpop.permute.xlu0 %20 }
  0x82   :  { %v23_v6 = vmul.f32 %v21_v3, %v15_v4  ;;  %v24_v7 = vmul.f32 %v21_v3, %v16_v5 }
  0x85   :  { %v29_v8 = vpop.permute.xlu0 %28 }
  0x86   :  { %v31_v9 = vadd.f32 %v29_v8, %v23_v6  ;;  %v32_v10 = vadd.f32 %v29_v8, %v24_v7 }
  0x88   :  { %33 = vst [vmem:[#allocation2] sm:$0x3f] %v31_v9  ;;  %34 = vst [vmem:[#allocation2 + $0x8] sm:$0x3f] %v32_v10 }
  0x89   :  { %63 = shalt.err (!%p60_p4)
}
  0x8a   :  { %s64_s0 = scalar_lea.hbm %s125_s3, 256 }
  0x8b   :  { %p65_p5 = scmp.ne.s32.totalorder %s125_s3, %s64_s0  ;;  %p68_p6 = scmp.lt.u32.totalorder %s64_s0, %s125_s3 }
  0x8d   :  { %p70_p7 = pnand %p68_p6, %p65_p5 }
  0x8f   :  { %73 = shalt.err (!%p70_p7)
}
  0x90   :  { %44 = dma.vmem_to_hbm [thread:$0]  %s42_s1, 256, %s125_s3, [#allocation3]  }
  0x91   :  { %74 = dma.done.wait [#allocation3], 256  }
  0x92   :  { %75 = vsyncadd [#allocation3], 4294967040 }
  0x93   :  { %48 = vsyncpa [#allocation3], 1 }

</bundles_post_ra>
